<compile_context>
chip_gen: v5e
topology: v5e:2x2
jax: 0.10.0
libtpu: 0.0.40
codegen_flags: <defaults>
</compile_context>

<pallas_src>
import functools

import jax
import jax.numpy as jnp
from jax.experimental import pallas as pl
from jax.experimental.pallas import tpu as pltpu


def _series_decomp_kernel(x_ref, res_ref, mean_ref, *, kernel_size: int):
    # x_ref   : (TB, L, C) input tile  (time on sublanes, channels on lanes)
    # res_ref : (TB, C, L) output tile (channels on sublanes, time on lanes)
    # mean_ref: (TB, C, L)
    TB, L, C = x_ref.shape
    pad = (kernel_size - 1) // 2
    inv_k = 1.0 / kernel_size

    # Time index along the lane axis of the (C, L) tiles; hoisted (loop-invariant).
    t_idx = jax.lax.broadcasted_iota(jnp.int32, (C, L), 1)
    edge_masks = [(t_idx < j, t_idx >= L - j) for j in range(1, pad + 1)]

    for b in range(TB):  # TB is small and static -> fully unrolled
        # One in-kernel transpose to the lane-dense (C, L) layout the outputs need.
        xt = jnp.transpose(x_ref[b], (1, 0)).astype(jnp.float32)      # (C, L)
        first = jnp.broadcast_to(xt[:, 0:1], (C, L))                  # x[:, 0]
        last = jnp.broadcast_to(xt[:, L - 1:L], (C, L))               # x[:, L-1]

        # Replicate-padded sliding-window sum:
        #   mean[t] = (1/k) * sum_{d=-pad..pad} x[clamp(t + d, 0, L - 1)]
        acc = xt                                                      # d = 0 term
        for j, (left_mask, right_mask) in zip(range(1, pad + 1), edge_masks):
            left = pltpu.roll(xt, shift=j % L, axis=1)         # left[t]  = x[t - j]
            acc = acc + jnp.where(left_mask, first, left)
            right = pltpu.roll(xt, shift=(-j) % L, axis=1)     # right[t] = x[t + j]
            acc = acc + jnp.where(right_mask, last, right)

        mean = acc * inv_k
        mean_ref[b] = mean.astype(mean_ref.dtype)
        res_ref[b] = (xt - mean).astype(res_ref.dtype)


def _pick_block_batch(B: int, L: int, C: int, itemsize: int) -> int:
    """Batch elements per grid step: large enough to amortize per-step overhead,
    small enough that (1 input + 2 output) double-buffered blocks stay well inside
    VMEM on v5e/v6e/v7x, and (when B allows) leaving >= 2 grid steps so the
    'parallel' batch axis can be sharded across TensorCores."""
    bytes_per_batch = max(L * C * itemsize, 1)
    tb = max(1, min(B, (1 << 20) // bytes_per_batch))  # ~1 MiB input per block
    if B >= 2:
        tb = min(tb, B // 2)                           # keep grid extent >= 2
    tb = max(tb, 1)
    while B % tb:                                      # avoid partial blocks
        tb -= 1
    return tb


@functools.partial(jax.jit, static_argnames=("kernel_size",))
def series_decomp(x, kernel_size: int):
    """x: (B, L, C).  Returns (residue, moving_mean), each (B, C, L).

    Matches SeriesDecomp.forward: AvgPool1d with stride=1, replicate front/end
    padding of (kernel_size - 1) // 2 (odd kernel_size assumed, as in the module).
    """
    B, L, C = x.shape
    tb = _pick_block_batch(B, L, C, x.dtype.itemsize)
    kern = functools.partial(_series_decomp_kernel, kernel_size=kernel_size)

    # TODO(synk): for very long sequences (single (L, C) slabs of tens of MiB),
    # tile along L with a pad-sized halo (manual DMA) instead of whole-L blocks.
    res, mean = pl.pallas_call(
        kern,
        out_shape=(
            jax.ShapeDtypeStruct((B, C, L), x.dtype),
            jax.ShapeDtypeStruct((B, C, L), x.dtype),
        ),
        grid=(B // tb,),
        in_specs=[pl.BlockSpec((tb, L, C), lambda b: (b, 0, 0))],
        out_specs=(
            pl.BlockSpec((tb, C, L), lambda b: (b, 0, 0)),
            pl.BlockSpec((tb, C, L), lambda b: (b, 0, 0)),
        ),
        compiler_params=pltpu.CompilerParams(
            dimension_semantics=("parallel",),
        ),
    )(x)
    return res, mean


def _reference(x, kernel_size: int):
    """Pure-JAX reference mirroring the PyTorch module."""
    B, L, C = x.shape
    pad = (kernel_size - 1) // 2
    xp = jnp.concatenate(
        [
            jnp.repeat(x[:, :1, :], pad, axis=1),
            x,
            jnp.repeat(x[:, -1:, :], pad, axis=1),
        ],
        axis=1,
    )
    windows = jnp.stack([xp[:, i:i + L, :] for i in range(kernel_size)], axis=0)
    mean = jnp.mean(windows, axis=0)
    res = x - mean
    return jnp.transpose(res, (0, 2, 1)), jnp.transpose(mean, (0, 2, 1))


if __name__ == "__main__":
    # SeriesDecomp has no learnable parameters; only kernel_size matters.
    kernel_size = 25       # classic decomposition window (odd, stride=1)
    B, L, C = 4, 128, 8    # small test: 4 series, 128 time steps, 8 channels

    key = jax.random.PRNGKey(0)
    x = jax.random.normal(key, (B, L, C), dtype=jnp.float32)

    res, mean = series_decomp(x, kernel_size)
    jax.block_until_ready(res)
    jax.block_until_ready(mean)

    res_ref, mean_ref = _reference(x, kernel_size)
    assert res.shape == (B, C, L) and mean.shape == (B, C, L)
    assert jnp.allclose(mean, mean_ref, atol=1e-5, rtol=1e-5)
    assert jnp.allclose(res, res_ref, atol=1e-5, rtol=1e-5)

    print("KERNEL_OK")
</pallas_src>

<mosaic_0001>
module attributes {stable_mosaic.version = 11 : i64} {
  func.func @_series_decomp_kernel(%arg0: i32, %arg1: memref<2x128x8xf32, #tpu.memory_space<vmem>>, %arg2: memref<2x8x128xf32, #tpu.memory_space<vmem>>, %arg3: memref<2x8x128xf32, #tpu.memory_space<vmem>>) attributes {dimension_semantics = [#tpu.dimension_semantics<parallel>], iteration_bounds = array<i64: 2>, scalar_prefetch = 0 : i64, scratch_operands = 0 : i64, tpu.core_type = #tpu.core_type<tc>, window_params = [{transform_indices = @transform_0, window_bounds = array<i64: 2, 128, 8>}, {transform_indices = @transform_1, window_bounds = array<i64: 2, 8, 128>}, {transform_indices = @transform_2, window_bounds = array<i64: 2, 8, 128>}]} {
    %0 = tpu.iota {dimensions = array<i32: 1>} : vector<8x128xi32>
    %c1_i32 = arith.constant 1 : i32
    %1 = vector.broadcast %c1_i32 : i32 to vector<8x128xi32>
    %2 = arith.cmpi slt, %0, %1 : vector<8x128xi32>
    %c127_i32 = arith.constant 127 : i32
    %3 = vector.broadcast %c127_i32 : i32 to vector<8x128xi32>
    %4 = arith.cmpi sge, %0, %3 : vector<8x128xi32>
    %c2_i32 = arith.constant 2 : i32
    %5 = vector.broadcast %c2_i32 : i32 to vector<8x128xi32>
    %6 = arith.cmpi slt, %0, %5 : vector<8x128xi32>
    %c126_i32 = arith.constant 126 : i32
    %7 = vector.broadcast %c126_i32 : i32 to vector<8x128xi32>
    %8 = arith.cmpi sge, %0, %7 : vector<8x128xi32>
    %c3_i32 = arith.constant 3 : i32
    %9 = vector.broadcast %c3_i32 : i32 to vector<8x128xi32>
    %10 = arith.cmpi slt, %0, %9 : vector<8x128xi32>
    %c125_i32 = arith.constant 125 : i32
    %11 = vector.broadcast %c125_i32 : i32 to vector<8x128xi32>
    %12 = arith.cmpi sge, %0, %11 : vector<8x128xi32>
    %c4_i32 = arith.constant 4 : i32
    %13 = vector.broadcast %c4_i32 : i32 to vector<8x128xi32>
    %14 = arith.cmpi slt, %0, %13 : vector<8x128xi32>
    %c124_i32 = arith.constant 124 : i32
    %15 = vector.broadcast %c124_i32 : i32 to vector<8x128xi32>
    %16 = arith.cmpi sge, %0, %15 : vector<8x128xi32>
    %c5_i32 = arith.constant 5 : i32
    %17 = vector.broadcast %c5_i32 : i32 to vector<8x128xi32>
    %18 = arith.cmpi slt, %0, %17 : vector<8x128xi32>
    %c123_i32 = arith.constant 123 : i32
    %19 = vector.broadcast %c123_i32 : i32 to vector<8x128xi32>
    %20 = arith.cmpi sge, %0, %19 : vector<8x128xi32>
    %c6_i32 = arith.constant 6 : i32
    %21 = vector.broadcast %c6_i32 : i32 to vector<8x128xi32>
    %22 = arith.cmpi slt, %0, %21 : vector<8x128xi32>
    %c122_i32 = arith.constant 122 : i32
    %23 = vector.broadcast %c122_i32 : i32 to vector<8x128xi32>
    %24 = arith.cmpi sge, %0, %23 : vector<8x128xi32>
    %c7_i32 = arith.constant 7 : i32
    %25 = vector.broadcast %c7_i32 : i32 to vector<8x128xi32>
    %26 = arith.cmpi slt, %0, %25 : vector<8x128xi32>
    %c121_i32 = arith.constant 121 : i32
    %27 = vector.broadcast %c121_i32 : i32 to vector<8x128xi32>
    %28 = arith.cmpi sge, %0, %27 : vector<8x128xi32>
    %c8_i32 = arith.constant 8 : i32
    %29 = vector.broadcast %c8_i32 : i32 to vector<8x128xi32>
    %30 = arith.cmpi slt, %0, %29 : vector<8x128xi32>
    %c120_i32 = arith.constant 120 : i32
    %31 = vector.broadcast %c120_i32 : i32 to vector<8x128xi32>
    %32 = arith.cmpi sge, %0, %31 : vector<8x128xi32>
    %c9_i32 = arith.constant 9 : i32
    %33 = vector.broadcast %c9_i32 : i32 to vector<8x128xi32>
    %34 = arith.cmpi slt, %0, %33 : vector<8x128xi32>
    %c119_i32 = arith.constant 119 : i32
    %35 = vector.broadcast %c119_i32 : i32 to vector<8x128xi32>
    %36 = arith.cmpi sge, %0, %35 : vector<8x128xi32>
    %c10_i32 = arith.constant 10 : i32
    %37 = vector.broadcast %c10_i32 : i32 to vector<8x128xi32>
    %38 = arith.cmpi slt, %0, %37 : vector<8x128xi32>
    %c118_i32 = arith.constant 118 : i32
    %39 = vector.broadcast %c118_i32 : i32 to vector<8x128xi32>
    %40 = arith.cmpi sge, %0, %39 : vector<8x128xi32>
    %c11_i32 = arith.constant 11 : i32
    %41 = vector.broadcast %c11_i32 : i32 to vector<8x128xi32>
    %42 = arith.cmpi slt, %0, %41 : vector<8x128xi32>
    %c117_i32 = arith.constant 117 : i32
    %43 = vector.broadcast %c117_i32 : i32 to vector<8x128xi32>
    %44 = arith.cmpi sge, %0, %43 : vector<8x128xi32>
    %c12_i32 = arith.constant 12 : i32
    %45 = vector.broadcast %c12_i32 : i32 to vector<8x128xi32>
    %46 = arith.cmpi slt, %0, %45 : vector<8x128xi32>
    %c116_i32 = arith.constant 116 : i32
    %47 = vector.broadcast %c116_i32 : i32 to vector<8x128xi32>
    %48 = arith.cmpi sge, %0, %47 : vector<8x128xi32>
    %c0 = arith.constant 0 : index
    %c0_0 = arith.constant 0 : index
    %c0_1 = arith.constant 0 : index
    %49 = vector.load %arg1[%c0, %c0_0, %c0_1] : memref<2x128x8xf32, #tpu.memory_space<vmem>>, vector<1x128x8xf32>
    %50 = vector.shape_cast %49 : vector<1x128x8xf32> to vector<128x8xf32>
    %51 = tpu.transpose %50, [1, 0] : vector<128x8xf32> -> vector<8x128xf32>
    %52 = vector.extract_strided_slice %51 {offsets = [0, 0], sizes = [8, 1], strides = [1, 1]} : vector<8x128xf32> to vector<8x1xf32>
    %53 = vector.shape_cast %52 : vector<8x1xf32> to vector<8x1xf32>
    %54 = vector.broadcast %53 : vector<8x1xf32> to vector<8x128xf32>
    %55 = vector.extract_strided_slice %51 {offsets = [0, 127], sizes = [8, 1], strides = [1, 1]} : vector<8x128xf32> to vector<8x1xf32>
    %56 = vector.shape_cast %55 : vector<8x1xf32> to vector<8x1xf32>
    %57 = vector.broadcast %56 : vector<8x1xf32> to vector<8x128xf32>
    %c1_i32_2 = arith.constant 1 : i32
    %58 = tpu.dynamic_rotate %51 by %c1_i32_2 dim 1 : vector<8x128xf32>, i32 -> vector<8x128xf32>
    %59 = arith.select %2, %54, %58 : vector<8x128xi1>, vector<8x128xf32>
    %60 = arith.addf %51, %59 : vector<8x128xf32>
    %c127_i32_3 = arith.constant 127 : i32
    %61 = tpu.dynamic_rotate %51 by %c127_i32_3 dim 1 : vector<8x128xf32>, i32 -> vector<8x128xf32>
    %62 = arith.select %4, %57, %61 : vector<8x128xi1>, vector<8x128xf32>
    %63 = arith.addf %60, %62 : vector<8x128xf32>
    %c2_i32_4 = arith.constant 2 : i32
    %64 = tpu.dynamic_rotate %51 by %c2_i32_4 dim 1 : vector<8x128xf32>, i32 -> vector<8x128xf32>
    %65 = arith.select %6, %54, %64 : vector<8x128xi1>, vector<8x128xf32>
    %66 = arith.addf %63, %65 : vector<8x128xf32>
    %c126_i32_5 = arith.constant 126 : i32
    %67 = tpu.dynamic_rotate %51 by %c126_i32_5 dim 1 : vector<8x128xf32>, i32 -> vector<8x128xf32>
    %68 = arith.select %8, %57, %67 : vector<8x128xi1>, vector<8x128xf32>
    %69 = arith.addf %66, %68 : vector<8x128xf32>
    %c3_i32_6 = arith.constant 3 : i32
    %70 = tpu.dynamic_rotate %51 by %c3_i32_6 dim 1 : vector<8x128xf32>, i32 -> vector<8x128xf32>
    %71 = arith.select %10, %54, %70 : vector<8x128xi1>, vector<8x128xf32>
    %72 = arith.addf %69, %71 : vector<8x128xf32>
    %c125_i32_7 = arith.constant 125 : i32
    %73 = tpu.dynamic_rotate %51 by %c125_i32_7 dim 1 : vector<8x128xf32>, i32 -> vector<8x128xf32>
    %74 = arith.select %12, %57, %73 : vector<8x128xi1>, vector<8x128xf32>
    %75 = arith.addf %72, %74 : vector<8x128xf32>
    %c4_i32_8 = arith.constant 4 : i32
    %76 = tpu.dynamic_rotate %51 by %c4_i32_8 dim 1 : vector<8x128xf32>, i32 -> vector<8x128xf32>
    %77 = arith.select %14, %54, %76 : vector<8x128xi1>, vector<8x128xf32>
    %78 = arith.addf %75, %77 : vector<8x128xf32>
    %c124_i32_9 = arith.constant 124 : i32
    %79 = tpu.dynamic_rotate %51 by %c124_i32_9 dim 1 : vector<8x128xf32>, i32 -> vector<8x128xf32>
    %80 = arith.select %16, %57, %79 : vector<8x128xi1>, vector<8x128xf32>
    %81 = arith.addf %78, %80 : vector<8x128xf32>
    %c5_i32_10 = arith.constant 5 : i32
    %82 = tpu.dynamic_rotate %51 by %c5_i32_10 dim 1 : vector<8x128xf32>, i32 -> vector<8x128xf32>
    %83 = arith.select %18, %54, %82 : vector<8x128xi1>, vector<8x128xf32>
    %84 = arith.addf %81, %83 : vector<8x128xf32>
    %c123_i32_11 = arith.constant 123 : i32
    %85 = tpu.dynamic_rotate %51 by %c123_i32_11 dim 1 : vector<8x128xf32>, i32 -> vector<8x128xf32>
    %86 = arith.select %20, %57, %85 : vector<8x128xi1>, vector<8x128xf32>
    %87 = arith.addf %84, %86 : vector<8x128xf32>
    %c6_i32_12 = arith.constant 6 : i32
    %88 = tpu.dynamic_rotate %51 by %c6_i32_12 dim 1 : vector<8x128xf32>, i32 -> vector<8x128xf32>
    %89 = arith.select %22, %54, %88 : vector<8x128xi1>, vector<8x128xf32>
    %90 = arith.addf %87, %89 : vector<8x128xf32>
    %c122_i32_13 = arith.constant 122 : i32
    %91 = tpu.dynamic_rotate %51 by %c122_i32_13 dim 1 : vector<8x128xf32>, i32 -> vector<8x128xf32>
    %92 = arith.select %24, %57, %91 : vector<8x128xi1>, vector<8x128xf32>
    %93 = arith.addf %90, %92 : vector<8x128xf32>
    %c7_i32_14 = arith.constant 7 : i32
    %94 = tpu.dynamic_rotate %51 by %c7_i32_14 dim 1 : vector<8x128xf32>, i32 -> vector<8x128xf32>
    %95 = arith.select %26, %54, %94 : vector<8x128xi1>, vector<8x128xf32>
    %96 = arith.addf %93, %95 : vector<8x128xf32>
    %c121_i32_15 = arith.constant 121 : i32
    %97 = tpu.dynamic_rotate %51 by %c121_i32_15 dim 1 : vector<8x128xf32>, i32 -> vector<8x128xf32>
    %98 = arith.select %28, %57, %97 : vector<8x128xi1>, vector<8x128xf32>
    %99 = arith.addf %96, %98 : vector<8x128xf32>
    %c8_i32_16 = arith.constant 8 : i32
    %100 = tpu.dynamic_rotate %51 by %c8_i32_16 dim 1 : vector<8x128xf32>, i32 -> vector<8x128xf32>
    %101 = arith.select %30, %54, %100 : vector<8x128xi1>, vector<8x128xf32>
    %102 = arith.addf %99, %101 : vector<8x128xf32>
    %c120_i32_17 = arith.constant 120 : i32
    %103 = tpu.dynamic_rotate %51 by %c120_i32_17 dim 1 : vector<8x128xf32>, i32 -> vector<8x128xf32>
    %104 = arith.select %32, %57, %103 : vector<8x128xi1>, vector<8x128xf32>
    %105 = arith.addf %102, %104 : vector<8x128xf32>
    %c9_i32_18 = arith.constant 9 : i32
    %106 = tpu.dynamic_rotate %51 by %c9_i32_18 dim 1 : vector<8x128xf32>, i32 -> vector<8x128xf32>
    %107 = arith.select %34, %54, %106 : vector<8x128xi1>, vector<8x128xf32>
    %108 = arith.addf %105, %107 : vector<8x128xf32>
    %c119_i32_19 = arith.constant 119 : i32
    %109 = tpu.dynamic_rotate %51 by %c119_i32_19 dim 1 : vector<8x128xf32>, i32 -> vector<8x128xf32>
    %110 = arith.select %36, %57, %109 : vector<8x128xi1>, vector<8x128xf32>
    %111 = arith.addf %108, %110 : vector<8x128xf32>
    %c10_i32_20 = arith.constant 10 : i32
    %112 = tpu.dynamic_rotate %51 by %c10_i32_20 dim 1 : vector<8x128xf32>, i32 -> vector<8x128xf32>
    %113 = arith.select %38, %54, %112 : vector<8x128xi1>, vector<8x128xf32>
    %114 = arith.addf %111, %113 : vector<8x128xf32>
    %c118_i32_21 = arith.constant 118 : i32
    %115 = tpu.dynamic_rotate %51 by %c118_i32_21 dim 1 : vector<8x128xf32>, i32 -> vector<8x128xf32>
    %116 = arith.select %40, %57, %115 : vector<8x128xi1>, vector<8x128xf32>
    %117 = arith.addf %114, %116 : vector<8x128xf32>
    %c11_i32_22 = arith.constant 11 : i32
    %118 = tpu.dynamic_rotate %51 by %c11_i32_22 dim 1 : vector<8x128xf32>, i32 -> vector<8x128xf32>
    %119 = arith.select %42, %54, %118 : vector<8x128xi1>, vector<8x128xf32>
    %120 = arith.addf %117, %119 : vector<8x128xf32>
    %c117_i32_23 = arith.constant 117 : i32
    %121 = tpu.dynamic_rotate %51 by %c117_i32_23 dim 1 : vector<8x128xf32>, i32 -> vector<8x128xf32>
    %122 = arith.select %44, %57, %121 : vector<8x128xi1>, vector<8x128xf32>
    %123 = arith.addf %120, %122 : vector<8x128xf32>
    %c12_i32_24 = arith.constant 12 : i32
    %124 = tpu.dynamic_rotate %51 by %c12_i32_24 dim 1 : vector<8x128xf32>, i32 -> vector<8x128xf32>
    %125 = arith.select %46, %54, %124 : vector<8x128xi1>, vector<8x128xf32>
    %126 = arith.addf %123, %125 : vector<8x128xf32>
    %c116_i32_25 = arith.constant 116 : i32
    %127 = tpu.dynamic_rotate %51 by %c116_i32_25 dim 1 : vector<8x128xf32>, i32 -> vector<8x128xf32>
    %128 = arith.select %48, %57, %127 : vector<8x128xi1>, vector<8x128xf32>
    %129 = arith.addf %126, %128 : vector<8x128xf32>
    %cst = arith.constant 4.000000e-02 : f32
    %130 = vector.broadcast %cst : f32 to vector<8x128xf32>
    %131 = arith.mulf %129, %130 : vector<8x128xf32>
    %c0_26 = arith.constant 0 : index
    %c0_27 = arith.constant 0 : index
    %c0_28 = arith.constant 0 : index
    %132 = vector.load %arg3[%c0_26, %c0_27, %c0_28] : memref<2x8x128xf32, #tpu.memory_space<vmem>>, vector<1x8x128xf32>
    %133 = vector.shape_cast %132 : vector<1x8x128xf32> to vector<8x128xf32>
    %134 = vector.shape_cast %131 : vector<8x128xf32> to vector<1x8x128xf32>
    tpu.vector_store %arg3[%c0_26, %c0_27, %c0_28], %134 {strides = array<i32>} : memref<2x8x128xf32, #tpu.memory_space<vmem>>, vector<1x8x128xf32>,
    %135 = arith.subf %51, %131 : vector<8x128xf32>
    %c0_29 = arith.constant 0 : index
    %c0_30 = arith.constant 0 : index
    %c0_31 = arith.constant 0 : index
    %136 = vector.load %arg2[%c0_29, %c0_30, %c0_31] : memref<2x8x128xf32, #tpu.memory_space<vmem>>, vector<1x8x128xf32>
    %137 = vector.shape_cast %136 : vector<1x8x128xf32> to vector<8x128xf32>
    %138 = vector.shape_cast %135 : vector<8x128xf32> to vector<1x8x128xf32>
    tpu.vector_store %arg2[%c0_29, %c0_30, %c0_31], %138 {strides = array<i32>} : memref<2x8x128xf32, #tpu.memory_space<vmem>>, vector<1x8x128xf32>,
    %c1 = arith.constant 1 : index
    %c0_32 = arith.constant 0 : index
    %c0_33 = arith.constant 0 : index
    %139 = vector.load %arg1[%c1, %c0_32, %c0_33] : memref<2x128x8xf32, #tpu.memory_space<vmem>>, vector<1x128x8xf32>
    %140 = vector.shape_cast %139 : vector<1x128x8xf32> to vector<128x8xf32>
    %141 = tpu.transpose %140, [1, 0] : vector<128x8xf32> -> vector<8x128xf32>
    %142 = vector.extract_strided_slice %141 {offsets = [0, 0], sizes = [8, 1], strides = [1, 1]} : vector<8x128xf32> to vector<8x1xf32>
    %143 = vector.shape_cast %142 : vector<8x1xf32> to vector<8x1xf32>
    %144 = vector.broadcast %143 : vector<8x1xf32> to vector<8x128xf32>
    %145 = vector.extract_strided_slice %141 {offsets = [0, 127], sizes = [8, 1], strides = [1, 1]} : vector<8x128xf32> to vector<8x1xf32>
    %146 = vector.shape_cast %145 : vector<8x1xf32> to vector<8x1xf32>
    %147 = vector.broadcast %146 : vector<8x1xf32> to vector<8x128xf32>
    %c1_i32_34 = arith.constant 1 : i32
    %148 = tpu.dynamic_rotate %141 by %c1_i32_34 dim 1 : vector<8x128xf32>, i32 -> vector<8x128xf32>
    %149 = arith.select %2, %144, %148 : vector<8x128xi1>, vector<8x128xf32>
    %150 = arith.addf %141, %149 : vector<8x128xf32>
    %c127_i32_35 = arith.constant 127 : i32
    %151 = tpu.dynamic_rotate %141 by %c127_i32_35 dim 1 : vector<8x128xf32>, i32 -> vector<8x128xf32>
    %152 = arith.select %4, %147, %151 : vector<8x128xi1>, vector<8x128xf32>
    %153 = arith.addf %150, %152 : vector<8x128xf32>
    %c2_i32_36 = arith.constant 2 : i32
    %154 = tpu.dynamic_rotate %141 by %c2_i32_36 dim 1 : vector<8x128xf32>, i32 -> vector<8x128xf32>
    %155 = arith.select %6, %144, %154 : vector<8x128xi1>, vector<8x128xf32>
    %156 = arith.addf %153, %155 : vector<8x128xf32>
    %c126_i32_37 = arith.constant 126 : i32
    %157 = tpu.dynamic_rotate %141 by %c126_i32_37 dim 1 : vector<8x128xf32>, i32 -> vector<8x128xf32>
    %158 = arith.select %8, %147, %157 : vector<8x128xi1>, vector<8x128xf32>
    %159 = arith.addf %156, %158 : vector<8x128xf32>
    %c3_i32_38 = arith.constant 3 : i32
    %160 = tpu.dynamic_rotate %141 by %c3_i32_38 dim 1 : vector<8x128xf32>, i32 -> vector<8x128xf32>
    %161 = arith.select %10, %144, %160 : vector<8x128xi1>, vector<8x128xf32>
    %162 = arith.addf %159, %161 : vector<8x128xf32>
    %c125_i32_39 = arith.constant 125 : i32
    %163 = tpu.dynamic_rotate %141 by %c125_i32_39 dim 1 : vector<8x128xf32>, i32 -> vector<8x128xf32>
    %164 = arith.select %12, %147, %163 : vector<8x128xi1>, vector<8x128xf32>
    %165 = arith.addf %162, %164 : vector<8x128xf32>
    %c4_i32_40 = arith.constant 4 : i32
    %166 = tpu.dynamic_rotate %141 by %c4_i32_40 dim 1 : vector<8x128xf32>, i32 -> vector<8x128xf32>
    %167 = arith.select %14, %144, %166 : vector<8x128xi1>, vector<8x128xf32>
    %168 = arith.addf %165, %167 : vector<8x128xf32>
    %c124_i32_41 = arith.constant 124 : i32
    %169 = tpu.dynamic_rotate %141 by %c124_i32_41 dim 1 : vector<8x128xf32>, i32 -> vector<8x128xf32>
    %170 = arith.select %16, %147, %169 : vector<8x128xi1>, vector<8x128xf32>
    %171 = arith.addf %168, %170 : vector<8x128xf32>
    %c5_i32_42 = arith.constant 5 : i32
    %172 = tpu.dynamic_rotate %141 by %c5_i32_42 dim 1 : vector<8x128xf32>, i32 -> vector<8x128xf32>
    %173 = arith.select %18, %144, %172 : vector<8x128xi1>, vector<8x128xf32>
    %174 = arith.addf %171, %173 : vector<8x128xf32>
    %c123_i32_43 = arith.constant 123 : i32
    %175 = tpu.dynamic_rotate %141 by %c123_i32_43 dim 1 : vector<8x128xf32>, i32 -> vector<8x128xf32>
    %176 = arith.select %20, %147, %175 : vector<8x128xi1>, vector<8x128xf32>
    %177 = arith.addf %174, %176 : vector<8x128xf32>
    %c6_i32_44 = arith.constant 6 : i32
    %178 = tpu.dynamic_rotate %141 by %c6_i32_44 dim 1 : vector<8x128xf32>, i32 -> vector<8x128xf32>
    %179 = arith.select %22, %144, %178 : vector<8x128xi1>, vector<8x128xf32>
    %180 = arith.addf %177, %179 : vector<8x128xf32>
    %c122_i32_45 = arith.constant 122 : i32
    %181 = tpu.dynamic_rotate %141 by %c122_i32_45 dim 1 : vector<8x128xf32>, i32 -> vector<8x128xf32>
    %182 = arith.select %24, %147, %181 : vector<8x128xi1>, vector<8x128xf32>
    %183 = arith.addf %180, %182 : vector<8x128xf32>
    %c7_i32_46 = arith.constant 7 : i32
    %184 = tpu.dynamic_rotate %141 by %c7_i32_46 dim 1 : vector<8x128xf32>, i32 -> vector<8x128xf32>
    %185 = arith.select %26, %144, %184 : vector<8x128xi1>, vector<8x128xf32>
    %186 = arith.addf %183, %185 : vector<8x128xf32>
    %c121_i32_47 = arith.constant 121 : i32
    %187 = tpu.dynamic_rotate %141 by %c121_i32_47 dim 1 : vector<8x128xf32>, i32 -> vector<8x128xf32>
    %188 = arith.select %28, %147, %187 : vector<8x128xi1>, vector<8x128xf32>
    %189 = arith.addf %186, %188 : vector<8x128xf32>
    %c8_i32_48 = arith.constant 8 : i32
    %190 = tpu.dynamic_rotate %141 by %c8_i32_48 dim 1 : vector<8x128xf32>, i32 -> vector<8x128xf32>
    %191 = arith.select %30, %144, %190 : vector<8x128xi1>, vector<8x128xf32>
    %192 = arith.addf %189, %191 : vector<8x128xf32>
    %c120_i32_49 = arith.constant 120 : i32
    %193 = tpu.dynamic_rotate %141 by %c120_i32_49 dim 1 : vector<8x128xf32>, i32 -> vector<8x128xf32>
    %194 = arith.select %32, %147, %193 : vector<8x128xi1>, vector<8x128xf32>
    %195 = arith.addf %192, %194 : vector<8x128xf32>
    %c9_i32_50 = arith.constant 9 : i32
    %196 = tpu.dynamic_rotate %141 by %c9_i32_50 dim 1 : vector<8x128xf32>, i32 -> vector<8x128xf32>
    %197 = arith.select %34, %144, %196 : vector<8x128xi1>, vector<8x128xf32>
    %198 = arith.addf %195, %197 : vector<8x128xf32>
    %c119_i32_51 = arith.constant 119 : i32
    %199 = tpu.dynamic_rotate %141 by %c119_i32_51 dim 1 : vector<8x128xf32>, i32 -> vector<8x128xf32>
    %200 = arith.select %36, %147, %199 : vector<8x128xi1>, vector<8x128xf32>
    %201 = arith.addf %198, %200 : vector<8x128xf32>
    %c10_i32_52 = arith.constant 10 : i32
    %202 = tpu.dynamic_rotate %141 by %c10_i32_52 dim 1 : vector<8x128xf32>, i32 -> vector<8x128xf32>
    %203 = arith.select %38, %144, %202 : vector<8x128xi1>, vector<8x128xf32>
    %204 = arith.addf %201, %203 : vector<8x128xf32>
    %c118_i32_53 = arith.constant 118 : i32
    %205 = tpu.dynamic_rotate %141 by %c118_i32_53 dim 1 : vector<8x128xf32>, i32 -> vector<8x128xf32>
    %206 = arith.select %40, %147, %205 : vector<8x128xi1>, vector<8x128xf32>
    %207 = arith.addf %204, %206 : vector<8x128xf32>
    %c11_i32_54 = arith.constant 11 : i32
    %208 = tpu.dynamic_rotate %141 by %c11_i32_54 dim 1 : vector<8x128xf32>, i32 -> vector<8x128xf32>
    %209 = arith.select %42, %144, %208 : vector<8x128xi1>, vector<8x128xf32>
    %210 = arith.addf %207, %209 : vector<8x128xf32>
    %c117_i32_55 = arith.constant 117 : i32
    %211 = tpu.dynamic_rotate %141 by %c117_i32_55 dim 1 : vector<8x128xf32>, i32 -> vector<8x128xf32>
    %212 = arith.select %44, %147, %211 : vector<8x128xi1>, vector<8x128xf32>
    %213 = arith.addf %210, %212 : vector<8x128xf32>
    %c12_i32_56 = arith.constant 12 : i32
    %214 = tpu.dynamic_rotate %141 by %c12_i32_56 dim 1 : vector<8x128xf32>, i32 -> vector<8x128xf32>
    %215 = arith.select %46, %144, %214 : vector<8x128xi1>, vector<8x128xf32>
    %216 = arith.addf %213, %215 : vector<8x128xf32>
    %c116_i32_57 = arith.constant 116 : i32
    %217 = tpu.dynamic_rotate %141 by %c116_i32_57 dim 1 : vector<8x128xf32>, i32 -> vector<8x128xf32>
    %218 = arith.select %48, %147, %217 : vector<8x128xi1>, vector<8x128xf32>
    %219 = arith.addf %216, %218 : vector<8x128xf32>
    %cst_58 = arith.constant 4.000000e-02 : f32
    %220 = vector.broadcast %cst_58 : f32 to vector<8x128xf32>
    %221 = arith.mulf %219, %220 : vector<8x128xf32>
    %c1_59 = arith.constant 1 : index
    %c0_60 = arith.constant 0 : index
    %c0_61 = arith.constant 0 : index
    %222 = vector.load %arg3[%c1_59, %c0_60, %c0_61] : memref<2x8x128xf32, #tpu.memory_space<vmem>>, vector<1x8x128xf32>
    %223 = vector.shape_cast %222 : vector<1x8x128xf32> to vector<8x128xf32>
    %224 = vector.shape_cast %221 : vector<8x128xf32> to vector<1x8x128xf32>
    tpu.vector_store %arg3[%c1_59, %c0_60, %c0_61], %224 {strides = array<i32>} : memref<2x8x128xf32, #tpu.memory_space<vmem>>, vector<1x8x128xf32>,
    %225 = arith.subf %141, %221 : vector<8x128xf32>
    %c1_62 = arith.constant 1 : index
    %c0_63 = arith.constant 0 : index
    %c0_64 = arith.constant 0 : index
    %226 = vector.load %arg2[%c1_62, %c0_63, %c0_64] : memref<2x8x128xf32, #tpu.memory_space<vmem>>, vector<1x8x128xf32>
    %227 = vector.shape_cast %226 : vector<1x8x128xf32> to vector<8x128xf32>
    %228 = vector.shape_cast %225 : vector<8x128xf32> to vector<1x8x128xf32>
    tpu.vector_store %arg2[%c1_62, %c0_63, %c0_64], %228 {strides = array<i32>} : memref<2x8x128xf32, #tpu.memory_space<vmem>>, vector<1x8x128xf32>,
    return
  }
  func.func @transform_0(%arg0: i32) -> (i32, i32, i32) {
    %c0_i32 = arith.constant 0 : i32
    %c0_i32_0 = arith.constant 0 : i32
    %c0_i32_1 = arith.constant 0 : i32
    return %arg0, %c0_i32, %c0_i32_0 : i32, i32, i32
  }
  func.func @transform_1(%arg0: i32) -> (i32, i32, i32) {
    %c0_i32 = arith.constant 0 : i32
    %c0_i32_0 = arith.constant 0 : i32
    %c0_i32_1 = arith.constant 0 : i32
    return %arg0, %c0_i32, %c0_i32_0 : i32, i32, i32
  }
  func.func @transform_2(%arg0: i32) -> (i32, i32, i32) {
    %c0_i32 = arith.constant 0 : i32
    %c0_i32_0 = arith.constant 0 : i32
    %c0_i32_1 = arith.constant 0 : i32
    return %arg0, %c0_i32, %c0_i32_0 : i32, i32, i32
  }
}

</mosaic_0001>

<bundles_post_ra>
// kernel: series_decomp.1
= control target key start
LH: loop header
LB: loop body
LE: loop exit
PB: predicated region body
PF: predicated region fallthrough
CT: control target
= control target key end

     0   :  { %8 = vsyncpa [#allocation3], 0  ;;  %s1332_s0 = inlined_call_operand.vmem [shape: f32[4,128,8], index: 0, kind: input, shape index: {}]   ;;  %s1333_s1 = inlined_call_operand.hbm [shape: f32[4,8,128], index: 1, kind: output, shape index: {0}]   ;;  %s1334_s2 = inlined_call_operand.hbm [shape: f32[4,8,128], index: 2, kind: output, shape index: {1}]  }
   0x1   :  { %10 = vsyncpa [#allocation3 + $0x1], 0 }
   0x2   :  { %11 = vsyncpa [#allocation5], 0 }
   0x3   :  { %13 = vsyncpa [#allocation5 + $0x1], 0  ;;  %s888_s9 = smov 0   ;;  %s890_s10 = smov 0  }
   0x4   :  { %s892_s11 = smov 0   ;;  %s894_s12 = smov 0  }
   0x5 LB: > { %s909_s13 = sadd.s32 4294967295, %s844_s12   ;;  %s636_s14 = sadd.s32 4294967294, %s844_s12   ;;  %s844_s12 = sphi %s894_s12, %s1377_s12   ;;  %s840_s11 = sphi %s892_s11, %s1376_s11   ;;  %s836_s10 = sphi %s890_s10, %s1375_s10   ;;  %s832_s9 = sphi %s888_s9, %s1374_s9  }
   0x6   : > { %s913_s15 = sadd.s32 1, %s844_s12   ;;  %s52_s16 = sadd.s32 1, %s840_s11 }
   0x7   : > { %s49_s17 = ssub.s32 %s844_s12, %s913_s15  ;;  %p62_p0 = scmp.ne.s32.totalorder %s840_s11, %s836_s10 }
   0x8   : > { %p50_p1 = scmp.eq.s32.totalorder %s49_s17, 0  ;;  %p63_p2 = scmp.eq.s32.totalorder %s909_s13, 1 }
   0x9   : > { %p68_p3 = scmp.ne.s32.totalorder %s836_s10, %s832_s9  ;;  %p69_p4 = scmp.eq.s32.totalorder %s636_s14, 1 }
   0xa   : > { %s924_s18 = scalar_select %p50_p1, %s840_s11, %s52_s16  }
   0xb   : > { %p926_p5 = por %p63_p2, %p62_p0  ;;  %p930_p6 = por %p69_p4, %p68_p3 }
   0xc   : > { %p639_p7 = scmp.ge.s32.totalorder %s844_s12, 1  ;;  %p123_p8 = scmp.lt.s32.totalorder %s844_s12, 3 }
   0xe   : > { %p124_p9 = pnand %p639_p7, %p123_p8 }
   0xf   : > { %s642_s21 = sshll.u32 (!%p124_p9), %s909_s13, 1  ;;  %s847_s26 = smov (!%p124_p9), 1  }
  0x10   : > { %127 = sbr.rel (%p124_p9) target bundleno = 777 (0x309), region = 24  ;;  %p152_p10 = scmp.lt.s32.totalorder (!%p124_p9), %s642_s21, 3 }
  0x11   : > { %s848_s27 = smov (!%p124_p9), 127   ;;  %s850_s28 = smov (!%p124_p9), 126  }
  0x12   : > { %s851_s29 = smov (!%p124_p9), 2   ;;  %s852_s30 = smov (!%p124_p9), 125  }
  0x13   : > { %s853_s3 = smov (!%p124_p9), 3   ;;  %s854_s4 = smov (!%p124_p9), 124  }
  0x14   : > { %s855_s5 = smov (!%p124_p9), 4   ;;  %s856_s6 = smov (!%p124_p9), 123  }
  0x15   : > { %s1379_s21 = smov (!%p152_p10, %s642_s21), 3  ;;  %v846_v12 = vmov 0   ;;  %v849_v18 = vmov 127   ;;  %s857_s7 = smov 5   ;;  %v160_v27 = vlaneseq }
  0x16   : > { %s671_s22 = sshll.u32 %s1379_s21, 7  ;;  %745 = vset.pattern.permute.xlu1 %v846_v12  ;;  %747 = vset.pattern.permute.xlu2 %v846_v12  ;;  %s1341_s8 = smov 122  }
  0x17   : > { %s940_s25 = scalar_lea.vmem %s1332_s0, %s671_s22  ;;  %s1353_s14 = smov 6   ;;  %v1016_v28 = vand.u32 127, %v160_v27 }
  0x18   : > { %v186_v0 = vld [vmem:[%s940_s25] sm:$0xff]  ;;  %v187_v1 = vld [vmem:[%s940_s25 + $0x8] sm:$0xff]  ;;  %v188_v2 = vld [vmem:[%s940_s25 + $0x10] sm:$0xff]  ;;  %s1335_s16 = smov 121   ;;  %s1336_s17 = smov 7  }
  0x19   : > { %202 = vxpose.xlu0.b32.start [1/16] (narrow) %v186_v0, 8  ;;  %v189_v3 = vld [vmem:[%s940_s25 + $0x18] sm:$0xff]  ;;  %v190_v4 = vld [vmem:[%s940_s25 + $0x20] sm:$0xff]  ;;  %v191_v5 = vld [vmem:[%s940_s25 + $0x28] sm:$0xff]  ;;  %s1337_s21 = smov 120   ;;  %s1338_s22 = smov 8  }
  0x1a   : > { %v192_v6 = vld [vmem:[%s940_s25 + $0x30] sm:$0xff]  ;;  %v193_v7 = vld [vmem:[%s940_s25 + $0x38] sm:$0xff]  ;;  %v194_v8 = vld [vmem:[%s940_s25 + $0x40] sm:$0xff]  ;;  %s1340_s23 = smov 119   ;;  %s865_s24 = smov 9   ;;  %vm162_vm0 = vcmp.lt.s32.totalorder %v1016_v28, 1 }
  0x1b   : > { %v195_v9 = vld [vmem:[%s940_s25 + $0x48] sm:$0xff]  ;;  %v196_v10 = vld [vmem:[%s940_s25 + $0x50] sm:$0xff]  ;;  %v197_v11 = vld [vmem:[%s940_s25 + $0x58] sm:$0xff]  ;;  %vm163_vm1 = vcmp.ge.s32.totalorder %v1016_v28, 127  ;;  %vm164_vm2 = vcmp.lt.s32.totalorder %v1016_v28, 2  ;;  %vm165_vm3 = vcmp.ge.s32.totalorder %v1016_v28, 126 }
  0x1c   : > { %v198_v13 = vld [vmem:[%s940_s25 + $0x60] sm:$0xff]  ;;  %v199_v14 = vld [vmem:[%s940_s25 + $0x68] sm:$0xff]  ;;  %v200_v15 = vld [vmem:[%s940_s25 + $0x70] sm:$0xff]  ;;  %vm166_vm4 = vcmp.lt.s32.totalorder %v1016_v28, 3  ;;  %vm167_vm5 = vcmp.ge.s32.totalorder %v1016_v28, 125  ;;  %vm168_vm6 = vcmp.lt.s32.totalorder %v1016_v28, 4 }
  0x1d   : > { %v201_v16 = vld [vmem:[%s940_s25 + $0x78] sm:$0xff]  ;;  %v645_v33 = vld [vmem:[%s940_s25 + $0x80] sm:$0xff]  ;;  %v646_v41 = vld [vmem:[%s940_s25 + $0x88] sm:$0xff]  ;;  %vm169_vm7 = vcmp.ge.s32.totalorder %v1016_v28, 124  ;;  %vm170_vm8 = vcmp.lt.s32.totalorder %v1016_v28, 5  ;;  %vm171_vm9 = vcmp.ge.s32.totalorder %v1016_v28, 123 }
  0x1e   : > { %v647_v51 = vld [vmem:[%s940_s25 + $0x90] sm:$0xff]  ;;  %vm172_vm10 = vcmp.lt.s32.totalorder %v1016_v28, 6  ;;  %v648_v59 = vld [vmem:[%s940_s25 + $0x98] sm:$0xff]  ;;  %vm173_vm11 = vcmp.ge.s32.totalorder %v1016_v28, 122  ;;  %vm1342_vm12 = vcmp.lt.s32.totalorder %v1016_v28, 7  ;;  %vm1344_vm13 = vcmp.ge.s32.totalorder %v1016_v28, 121 }
  0x1f   : > { %vm1343_vm14 = vcmp.lt.s32.totalorder %v1016_v28, 8  ;;  %vm1346_vm15 = vcmp.ge.s32.totalorder %v1016_v28, 120 }
  0x21   : > { %203 = vxpose.xlu0.b32.cont [2/16] (narrow) %v187_v1, 8  ;;  %v649_v1 = vld [vmem:[%s940_s25 + $0xa0] sm:$0xff] }
  0x29   : > { %204 = vxpose.xlu0.b32.cont [3/16] (narrow) %v188_v2, 8 }
  0x31   : > { %205 = vxpose.xlu0.b32.cont [4/16] (narrow) %v189_v3, 8 }
  0x39   : > { %206 = vxpose.xlu0.b32.cont [5/16] (narrow) %v190_v4, 8 }
  0x41   : > { %207 = vxpose.xlu0.b32.cont [6/16] (narrow) %v191_v5, 8 }
  0x49   : > { %208 = vxpose.xlu0.b32.cont [7/16] (narrow) %v192_v6, 8 }
  0x51   : > { %209 = vxpose.xlu0.b32.cont [8/16] (narrow) %v193_v7, 8 }
  0x59   : > { %210 = vxpose.xlu0.b32.cont [9/16] (narrow) %v194_v8, 8 }
  0x61   : > { %211 = vxpose.xlu0.b32.cont [10/16] (narrow) %v195_v9, 8 }
  0x69   : > { %212 = vxpose.xlu0.b32.cont [11/16] (narrow) %v196_v10, 8 }
  0x71   : > { %213 = vxpose.xlu0.b32.cont [12/16] (narrow) %v197_v11, 8  ;;  %v650_v11 = vld [vmem:[%s940_s25 + $0xa8] sm:$0xff] }
  0x79   : > { %214 = vxpose.xlu0.b32.cont [13/16] (narrow) %v198_v13, 8 }
  0x81   : > { %215 = vxpose.xlu0.b32.cont [14/16] (narrow) %v199_v14, 8 }
  0x89   : > { %216 = vxpose.xlu0.b32.cont [15/16] (narrow) %v200_v15, 8 }
  0x91   : > { %217 = vxpose.xlu0.b32.end [16/16] (narrow) %v201_v16, 8 }
  0xbd   : > { %v958_v17 = vpop.trf.xlu0 }
  0xbe   : > { %243 = vrot.lane.b32.xlu2 %v958_v17, %s847_s26  ;;  %236 = vperm.xlu1 %745, %v958_v17  }
  0xc6   : > { %247 = vrot.lane.b32.xlu2 %v958_v17, %s848_s27  ;;  %746 = vset.pattern.permute.xlu1 %v849_v18 }
  0xc7   : > { %240 = vperm.xlu1 %746, %v958_v17  }
  0xce   : > { %255 = vrot.lane.b32.xlu2 %v958_v17, %s850_s28 }
  0xcf   : > { %251 = vrot.lane.b32.xlu1 %v958_v17, %s851_s29 }
  0xd6   : > { %263 = vrot.lane.b32.xlu2 %v958_v17, %s852_s30 }
  0xd7   : > { %259 = vrot.lane.b32.xlu1 %v958_v17, %s853_s3 }
  0xde   : > { %271 = vrot.lane.b32.xlu2 %v958_v17, %s854_s4 }
  0xdf   : > { %267 = vrot.lane.b32.xlu1 %v958_v17, %s855_s5 }
  0xe6   : > { %279 = vrot.lane.b32.xlu2 %v958_v17, %s856_s6 }
  0xe7   : > { %275 = vrot.lane.b32.xlu1 %v958_v17, %s857_s7 }
  0xee   : > { %287 = vrot.lane.b32.xlu2 %v958_v17, %s1341_s8  ;;  %s871_s8 = smov 12  }
  0xef   : > { %283 = vrot.lane.b32.xlu1 %v958_v17, %s1353_s14 }
  0xf6   : > { %295 = vrot.lane.b32.xlu2 %v958_v17, %s1335_s16  ;;  %s1352_s16 = smov 118  }
  0xf7   : > { %291 = vrot.lane.b32.xlu1 %v958_v17, %s1336_s17  ;;  %s867_s17 = smov 10  }
  0xf8   : > { %749 = vset.pattern.permute.xlu0 %v849_v18 }
  0xfe   : > { %303 = vrot.lane.b32.xlu2 %v958_v17, %s1337_s21  ;;  %s1351_s21 = smov 117  }
  0xff   : > { %299 = vrot.lane.b32.xlu1 %v958_v17, %s1338_s22  ;;  %s869_s22 = smov 11  }
 0x106   : > { %311 = vrot.lane.b32.xlu2 %v958_v17, %s1340_s23  ;;  %s1349_s23 = smov 116  }
 0x107   : > { %307 = vrot.lane.b32.xlu1 %v958_v17, %s865_s24 }
 0x10e   : > { %319 = vrot.lane.b32.xlu2 %v958_v17, %s1352_s16 }
 0x10f   : > { %315 = vrot.lane.b32.xlu1 %v958_v17, %s867_s17 }
 0x116   : > { %327 = vrot.lane.b32.xlu2 %v958_v17, %s1351_s21 }
 0x117   : > { %323 = vrot.lane.b32.xlu1 %v958_v17, %s869_s22 }
 0x118   : > { %v244_v19 = vpop.permute.xlu2 %243 }
 0x11e   : > { %335 = vrot.lane.b32.xlu2 %v958_v17, %s1349_s23  ;;  %s1117_s23 = sand.u32 1, %s836_s10  }
 0x11f   : > { %331 = vrot.lane.b32.xlu1 %v958_v17, %s871_s8  ;;  %s640_s21 = sshll.u32 %s1117_s23, 4 }
 0x120   : > { %v248_v20 = vpop.permute.xlu2 %247  ;;  %s1128_s16 = scalar_lea.vmem [#allocation4], %s640_s21  ;;  %s1133_s14 = scalar_lea.vmem [#allocation2], %s640_s21 }
 0x128   : > { %v256_v21 = vpop.permute.xlu2 %255 }
 0x130   : > { %v1012_v22 = vpop.permute.xlu1 %236  ;;  %v264_v23 = vpop.permute.xlu2 %263 }
 0x131   : > { %v245_v31 = vsel %vm162_vm0, %v1012_v22, %v244_v19 }
 0x132   : > { %v246_v35 = vadd.f32 %v245_v31, %v958_v17  ;;  %v652_v31 = vld [vmem:[%s940_s25 + $0xb8] sm:$0xff] }
 0x138   : > { %v272_v25 = vpop.permute.xlu2 %271 }
 0x139   : > { %v1014_v24 = vpop.permute.xlu1 %240 }
 0x13a   : > { %v249_v34 = vsel %vm163_vm1, %v1014_v24, %v248_v20  ;;  %v257_v42 = vsel %vm165_vm3, %v1014_v24, %v256_v21  ;;  %v265_v47 = vsel %vm167_vm5, %v1014_v24, %v264_v23  ;;  %v273_v53 = vsel %vm169_vm7, %v1014_v24, %v272_v25  ;;  %v651_v21 = vld [vmem:[%s940_s25 + $0xb0] sm:$0xff] }
 0x13b   : > { %v250_v37 = vadd.f32 %v249_v34, %v246_v35 }
 0x140   : > { %v280_v30 = vpop.permute.xlu2 %279 }
 0x141   : > { %v252_v26 = vpop.permute.xlu1 %251  ;;  %v281_v60 = vsel %vm171_vm9, %v1014_v24, %v280_v30 }
 0x142   : > { %v253_v36 = vsel %vm164_vm2, %v1012_v22, %v252_v26 }
 0x143   : > { %v254_v39 = vadd.f32 %v253_v36, %v250_v37 }
 0x145   : > { %v258_v44 = vadd.f32 %v257_v42, %v254_v39 }
 0x148   : > { %v288_v38 = vpop.permute.xlu2 %287 }
 0x149   : > { %v260_v29 = vpop.permute.xlu1 %259  ;;  %v289_v2 = vsel %vm173_vm11, %v1014_v24, %v288_v38 }
 0x14a   : > { %v261_v43 = vsel %vm166_vm4, %v1012_v22, %v260_v29 }
 0x14b   : > { %v262_v45 = vadd.f32 %v261_v43, %v258_v44 }
 0x14d   : > { %v266_v49 = vadd.f32 %v265_v47, %v262_v45  ;;  %v655_v47 = vld [vmem:[%s940_s25 + $0xd0] sm:$0xff] }
 0x150   : > { %v296_v46 = vpop.permute.xlu2 %295 }
 0x151   : > { %v268_v32 = vpop.permute.xlu1 %267  ;;  %v297_v7 = vsel %vm1344_vm13, %v1014_v24, %v296_v46  ;;  %vm1347_vm13 = vcmp.lt.s32.totalorder %v1016_v28, 10  ;;  %v654_v46 = vld [vmem:[%s940_s25 + $0xc8] sm:$0xff] }
 0x152   : > { %v269_v48 = vsel %vm168_vm6, %v1012_v22, %v268_v32 }
 0x153   : > { %v270_v52 = vadd.f32 %v269_v48, %v266_v49  ;;  %v657_v48 = vld [vmem:[%s940_s25 + $0xe0] sm:$0xff]  ;;  %v658_v49 = vld [vmem:[%s940_s25 + $0xe8] sm:$0xff] }
 0x154   : > { %360 = vxpose.xlu1.b32.start [1/16] (narrow) %v645_v33, 8 }
 0x155   : > { %v274_v55 = vadd.f32 %v273_v53, %v270_v52 }
 0x158   : > { %v304_v56 = vpop.permute.xlu2 %303 }
 0x159   : > { %v276_v40 = vpop.permute.xlu1 %275  ;;  %v305_v14 = vsel %vm1346_vm15, %v1014_v24, %v304_v56  ;;  %vm182_vm15 = vcmp.lt.s32.totalorder %v1016_v28, 11 }
 0x15a   : > { %v277_v54 = vsel %vm170_vm8, %v1012_v22, %v276_v40  ;;  %v653_v40 = vld [vmem:[%s940_s25 + $0xc0] sm:$0xff] }
 0x15b   : > { %v278_v57 = vadd.f32 %v277_v54, %v274_v55 }
 0x15c   : > { %361 = vxpose.xlu1.b32.cont [2/16] (narrow) %v646_v41, 8 }
 0x15d   : > { %v282_v62 = vadd.f32 %v281_v60, %v278_v57 }
 0x160   : > { %v312_v4 = vpop.permute.xlu2 %311 }
 0x161   : > { %v284_v50 = vpop.permute.xlu1 %283 }
 0x162   : > { %v285_v61 = vsel %vm172_vm10, %v1012_v22, %v284_v50  ;;  %v659_v50 = vld [vmem:[%s940_s25 + $0xf0] sm:$0xff] }
 0x163   : > { %v286_v63 = vadd.f32 %v285_v61, %v282_v62 }
 0x164   : > { %362 = vxpose.xlu1.b32.cont [3/16] (narrow) %v647_v51, 8  ;;  %v660_v51 = vld [vmem:[%s940_s25 + $0xf8] sm:$0xff] }
 0x165   : > { %v290_v5 = vadd.f32 %v289_v2, %v286_v63 }
 0x168   : > { %v320_v13 = vpop.permute.xlu2 %319 }
 0x169   : > { %v292_v58 = vpop.permute.xlu1 %291 }
 0x16a   : > { %v293_v3 = vsel %vm1342_vm12, %v1012_v22, %v292_v58  ;;  %vm1345_vm12 = vcmp.lt.s32.totalorder %v1016_v28, 9 }
 0x16b   : > { %v294_v6 = vadd.f32 %v293_v3, %v290_v5 }
 0x16c   : > { %363 = vxpose.xlu1.b32.cont [4/16] (narrow) %v648_v59, 8 }
 0x16d   : > { %v298_v9 = vadd.f32 %v297_v7, %v294_v6 }
 0x170   : > { %v328_v27 = vpop.permute.xlu2 %327 }
 0x171   : > { %v300_v0 = vpop.permute.xlu1 %299 }
 0x172   : > { %v301_v8 = vsel %vm1343_vm14, %v1012_v22, %v300_v0  ;;  %vm1348_vm14 = vcmp.ge.s32.totalorder %v1016_v28, 119 }
 0x173   : > { %v302_v12 = vadd.f32 %v301_v8, %v298_v9  ;;  %v313_v23 = vsel %vm1348_vm14, %v1014_v24, %v312_v4  ;;  %vm184_vm14 = vcmp.lt.s32.totalorder %v1016_v28, 12 }
 0x174   : > { %364 = vxpose.xlu1.b32.cont [5/16] (narrow) %v649_v1, 8 }
 0x175   : > { %v306_v16 = vadd.f32 %v305_v14, %v302_v12 }
 0x178   : > { %v336_v37 = vpop.permute.xlu2 %335 }
 0x179   : > { %v308_v10 = vpop.permute.xlu1 %307 }
 0x17a   : > { %v309_v15 = vsel %vm1345_vm12, %v1012_v22, %v308_v10  ;;  %vm1350_vm12 = vcmp.ge.s32.totalorder %v1016_v28, 118 }
 0x17b   : > { %v310_v19 = vadd.f32 %v309_v15, %v306_v16  ;;  %v321_v32 = vsel %vm1350_vm12, %v1014_v24, %v320_v13  ;;  %vm185_vm12 = vcmp.ge.s32.totalorder %v1016_v28, 116 }
 0x17c   : > { %365 = vxpose.xlu1.b32.cont [6/16] (narrow) %v650_v11, 8  ;;  %v337_v43 = vsel %vm185_vm12, %v1014_v24, %v336_v37 }
 0x17d   : > { %v314_v26 = vadd.f32 %v313_v23, %v310_v19 }
 0x181   : > { %v316_v20 = vpop.permute.xlu1 %315 }
 0x182   : > { %v317_v25 = vsel %vm1347_vm13, %v1012_v22, %v316_v20  ;;  %vm183_vm13 = vcmp.ge.s32.totalorder %v1016_v28, 117 }
 0x183   : > { %v318_v29 = vadd.f32 %v317_v25, %v314_v26  ;;  %v329_v36 = vsel %vm183_vm13, %v1014_v24, %v328_v27  ;;  %v656_v24 = vld [vmem:[%s940_s25 + $0xd8] sm:$0xff]  ;;  %s1356_s25 = smov 6  }
 0x184   : > { %366 = vxpose.xlu1.b32.cont [7/16] (narrow) %v651_v21, 8 }
 0x185   : > { %v322_v34 = vadd.f32 %v321_v32, %v318_v29 }
 0x189   : > { %v324_v30 = vpop.permute.xlu1 %323 }
 0x18a   : > { %v325_v33 = vsel %vm182_vm15, %v1012_v22, %v324_v30 }
 0x18b   : > { %v326_v35 = vadd.f32 %v325_v33, %v322_v34 }
 0x18c   : > { %367 = vxpose.xlu1.b32.cont [8/16] (narrow) %v652_v31, 8 }
 0x18d   : > { %v330_v38 = vadd.f32 %v329_v36, %v326_v35 }
 0x191   : > { %v332_v39 = vpop.permute.xlu1 %331 }
 0x192   : > { %v333_v41 = vsel %vm184_vm14, %v1012_v22, %v332_v39 }
 0x193   : > { %v334_v42 = vadd.f32 %v333_v41, %v330_v38 }
 0x194   : > { %368 = vxpose.xlu1.b32.cont [9/16] (narrow) %v653_v40, 8 }
 0x195   : > { %v338_v44 = vadd.f32 %v337_v43, %v334_v42 }
 0x197   : > { %v339_v45 = vmul.f32 0.04, %v338_v44 }
 0x199   : > { %340 = vst [vmem:[%s1128_s16] sm:$0xff] %v339_v45  ;;  %v341_v22 = vsub.f32 %v958_v17, %v339_v45 }
 0x19b   : > { %342 = vst [vmem:[%s1133_s14] sm:$0xff] %v341_v22 }
 0x19c   : > { %369 = vxpose.xlu1.b32.cont [10/16] (narrow) %v654_v46, 8 }
 0x1a4   : > { %370 = vxpose.xlu1.b32.cont [11/16] (narrow) %v655_v47, 8 }
 0x1ac   : > { %371 = vxpose.xlu1.b32.cont [12/16] (narrow) %v656_v24, 8 }
 0x1b4   : > { %372 = vxpose.xlu1.b32.cont [13/16] (narrow) %v657_v48, 8 }
 0x1bc   : > { %373 = vxpose.xlu1.b32.cont [14/16] (narrow) %v658_v49, 8 }
 0x1c4   : > { %374 = vxpose.xlu1.b32.cont [15/16] (narrow) %v659_v50, 8 }
 0x1cc   : > { %375 = vxpose.xlu1.b32.end [16/16] (narrow) %v660_v51, 8 }
 0x1f8   : > { %v1142_v52 = vpop.trf.xlu1 }
 0x1f9   : > { %405 = vrot.lane.b32.xlu0 %v1142_v52, %s848_s27  ;;  %394 = vperm.xlu2 %747, %v1142_v52   ;;  %s1358_s27 = smov 7  }
 0x201   : > { %465 = vrot.lane.b32.xlu0 %v1142_v52, %s865_s24  ;;  %401 = vrot.lane.b32.xlu2 %v1142_v52, %s847_s26  ;;  %s1357_s26 = smov 122  }
 0x202   : > { %748 = vset.pattern.permute.xlu2 %v849_v18 }
 0x209   : > { %473 = vrot.lane.b32.xlu0 %v1142_v52, %s867_s17  ;;  %398 = vperm.xlu2 %748, %v1142_v52  }
 0x211   : > { %481 = vrot.lane.b32.xlu0 %v1142_v52, %s869_s22  ;;  %409 = vrot.lane.b32.xlu2 %v1142_v52, %s851_s29  ;;  %s1360_s29 = smov 8  }
 0x219   : > { %489 = vrot.lane.b32.xlu0 %v1142_v52, %s871_s8  ;;  %413 = vrot.lane.b32.xlu2 %v1142_v52, %s850_s28  ;;  %s1359_s28 = smov 121  }
 0x221   : > { %417 = vrot.lane.b32.xlu2 %v1142_v52, %s853_s3  ;;  %s1362_s3 = smov 119  }
 0x229   : > { %421 = vrot.lane.b32.xlu2 %v1142_v52, %s852_s30  ;;  %s1361_s30 = smov 120  }
 0x231   : > { %425 = vrot.lane.b32.xlu2 %v1142_v52, %s855_s5  ;;  %s1364_s5 = smov 117  }
 0x239   : > { %429 = vrot.lane.b32.xlu2 %v1142_v52, %s854_s4  ;;  %s1363_s4 = smov 118  }
 0x241   : > { %433 = vrot.lane.b32.xlu2 %v1142_v52, %s857_s7  ;;  %s672_s7 = sshll.u32 %s909_s13, 4 }
 0x242   : > { %s537_s21 = scalar_lea.hbm %s1334_s2, %s672_s7 }
 0x243   : > { %s540_s13 = sshll.u32 %s537_s21, 4  ;;  %s541_s13 = int_to_ptr.hbm [resolvable:$true] %s540_s13 }
 0x249   : > { %437 = vrot.lane.b32.xlu2 %v1142_v52, %s856_s6  ;;  %s1365_s6 = smov 116  }
 0x251   : > { %441 = vrot.lane.b32.xlu2 %v1142_v52, %s1356_s25  ;;  %s520_s25 = scalar_lea.hbm %s1333_s1, %s672_s7  ;;  %s770_s7 = scalar_lea.hbm %s1334_s2, 32 }
 0x253   : > { %v1177_v17 = vpop.permute.xlu2 %394 }
 0x259   : > { %445 = vrot.lane.b32.xlu2 %v1142_v52, %s1357_s26  ;;  %s538_s26 = sshll.u32 %s1128_s16, 4  ;;  %s539_s26 = int_to_ptr.vmem [resolvable:$true] %s538_s26 }
 0x25b   : > { %v402_v18 = vpop.permute.xlu2 %401 }
 0x25c   : > { %v403_v54 = vsel %vm162_vm0, %v1177_v17, %v402_v18  ;;  %vm1366_vm0 = vcmp.lt.s32.totalorder %v1016_v28, 7 }
 0x25d   : > { %v404_v55 = vadd.f32 %v403_v54, %v1142_v52 }
 0x261   : > { %449 = vrot.lane.b32.xlu2 %v1142_v52, %s1358_s27  ;;  %s521_s27 = sshll.u32 %s1133_s14, 4  ;;  %s1283_s27 = int_to_ptr.vmem [resolvable:$true] %s521_s27 }
 0x263   : > { %v1183_v53 = vpop.permute.xlu2 %398 }
 0x269   : > { %453 = vrot.lane.b32.xlu2 %v1142_v52, %s1359_s28  ;;  %s523_s28 = sshll.u32 %s520_s25, 4  ;;  %s1285_s28 = int_to_ptr.hbm [resolvable:$true] %s523_s28 }
 0x26b   : > { %v406_v56 = vpop.permute.xlu0 %405  ;;  %v410_v57 = vpop.permute.xlu2 %409 }
 0x26c   : > { %v407_v58 = vsel %vm163_vm1, %v1183_v53, %v406_v56  ;;  %v411_v60 = vsel %vm164_vm2, %v1177_v17, %v410_v57  ;;  %vm1367_vm1 = vcmp.ge.s32.totalorder %v1016_v28, 121  ;;  %vm1368_vm2 = vcmp.lt.s32.totalorder %v1016_v28, 8 }
 0x26d   : > { %v408_v59 = vadd.f32 %v407_v58, %v404_v55 }
 0x26f   : > { %v412_v61 = vadd.f32 %v411_v60, %v408_v59 }
 0x271   : > { %457 = vrot.lane.b32.xlu2 %v1142_v52, %s1360_s29 }
 0x273   : > { %v414_v62 = vpop.permute.xlu2 %413  ;;  %v466_v29 = vpop.permute.xlu0 %465 }
 0x274   : > { %v415_v63 = vsel %vm165_vm3, %v1183_v53, %v414_v62  ;;  %vm1369_vm3 = vcmp.ge.s32.totalorder %v1016_v28, 120 }
 0x275   : > { %v416_v0 = vadd.f32 %v415_v63, %v412_v61 }
 0x279   : > { %461 = vrot.lane.b32.xlu2 %v1142_v52, %s1361_s30  ;;  %s509_s30 = scalar_lea.sflag [#allocation5], %s1117_s23 }
 0x27b   : > { %v418_v1 = vpop.permute.xlu2 %417  ;;  %v474_v41 = vpop.permute.xlu0 %473 }
 0x27c   : > { %v419_v2 = vsel %vm166_vm4, %v1177_v17, %v418_v1  ;;  %vm1370_vm4 = vcmp.lt.s32.totalorder %v1016_v28, 9 }
 0x27d   : > { %v420_v3 = vadd.f32 %v419_v2, %v416_v0  ;;  %v467_v45 = vsel %vm1370_vm4, %v1177_v17, %v466_v29 }
 0x281   : > { %469 = vrot.lane.b32.xlu2 %v1142_v52, %s1362_s3  ;;  %s764_s3 = sshra.s32 %s541_s13, 4  ;;  %s765_s3 = int_to_ptr.hbm [resolvable:$true] %s764_s3 }
 0x282   : > { %p771_p0 = scmp.lt.s32.totalorder %s765_s3, %s1334_s2 }
 0x283   : > { %v422_v4 = vpop.permute.xlu2 %421  ;;  %v482_v48 = vpop.permute.xlu0 %481 }
 0x284   : > { %v423_v5 = vsel %vm167_vm5, %v1183_v53, %v422_v4  ;;  %vm1371_vm5 = vcmp.ge.s32.totalorder %v1016_v28, 119  ;;  %v483_v55 = vsel %vm182_vm15, %v1177_v17, %v482_v48 }
 0x285   : > { %v424_v6 = vadd.f32 %v423_v5, %v420_v3 }
 0x289   : > { %477 = vrot.lane.b32.xlu2 %v1142_v52, %s1363_s4  ;;  %s766_s4 = scalar_lea.hbm %s765_s3, 16 }
 0x28a   : > { %p767_p11 = scmp.ne.s32.totalorder %s765_s3, %s766_s4  ;;  %p772_p1 = scmp.lt.s32.totalorder %s770_s7, %s766_s4 }
 0x28b   : > { %v426_v7 = vpop.permute.xlu2 %425  ;;  %v490_v58 = vpop.permute.xlu0 %489 }
 0x28c   : > { %v427_v8 = vsel %vm168_vm6, %v1177_v17, %v426_v7  ;;  %vm1372_vm6 = vcmp.lt.s32.totalorder %v1016_v28, 10  ;;  %v491_v60 = vsel %vm184_vm14, %v1177_v17, %v490_v58  ;;  %p768_p12 = pnand %p767_p11, %p926_p5  ;;  %p773_p2 = por %p772_p1, %p771_p0 }
 0x28d   : > { %v428_v9 = vadd.f32 %v427_v8, %v424_v6  ;;  %v475_v49 = vsel %vm1372_vm6, %v1177_v17, %v474_v41 }
 0x28e   : > { %p769_p13 = pneg %p768_p12 }
 0x290   : > { %p774_p3 = pnand %p773_p2, %p769_p13 }
 0x291   : > { %485 = vrot.lane.b32.xlu2 %v1142_v52, %s1364_s5 }
 0x293   : > { %v430_v10 = vpop.permute.xlu2 %429 }
 0x294   : > { %v431_v11 = vsel %vm169_vm7, %v1183_v53, %v430_v10  ;;  %vm1373_vm7 = vcmp.ge.s32.totalorder %v1016_v28, 118 }
 0x295   : > { %v432_v12 = vadd.f32 %v431_v11, %v428_v9 }
 0x299   : > { %493 = vrot.lane.b32.xlu2 %v1142_v52, %s1365_s6 }
 0x29b   : > { %v434_v13 = vpop.permute.xlu2 %433 }
 0x29c   : > { %v435_v23 = vsel %vm170_vm8, %v1177_v17, %v434_v13 }
 0x29d   : > { %v436_v26 = vadd.f32 %v435_v23, %v432_v12 }
 0x2a3   : > { %v438_v14 = vpop.permute.xlu2 %437 }
 0x2a4   : > { %v439_v25 = vsel %vm171_vm9, %v1183_v53, %v438_v14 }
 0x2a5   : > { %v440_v30 = vadd.f32 %v439_v25, %v436_v26 }
 0x2ab   : > { %v442_v15 = vpop.permute.xlu2 %441 }
 0x2ac   : > { %v443_v27 = vsel %vm172_vm10, %v1177_v17, %v442_v15 }
 0x2ad   : > { %v444_v32 = vadd.f32 %v443_v27, %v440_v30 }
 0x2b3   : > { %v446_v16 = vpop.permute.xlu2 %445 }
 0x2b4   : > { %v447_v31 = vsel %vm173_vm11, %v1183_v53, %v446_v16 }
 0x2b5   : > { %v448_v35 = vadd.f32 %v447_v31, %v444_v32 }
 0x2bb   : > { %v450_v19 = vpop.permute.xlu2 %449 }
 0x2bc   : > { %v451_v34 = vsel %vm1366_vm0, %v1177_v17, %v450_v19 }
 0x2bd   : > { %v452_v37 = vadd.f32 %v451_v34, %v448_v35 }
 0x2c3   : > { %v454_v20 = vpop.permute.xlu2 %453 }
 0x2c4   : > { %v455_v36 = vsel %vm1367_vm1, %v1183_v53, %v454_v20 }
 0x2c5   : > { %v456_v39 = vadd.f32 %v455_v36, %v452_v37 }
 0x2cb   : > { %v458_v21 = vpop.permute.xlu2 %457 }
 0x2cc   : > { %v459_v38 = vsel %vm1368_vm2, %v1177_v17, %v458_v21 }
 0x2cd   : > { %v460_v42 = vadd.f32 %v459_v38, %v456_v39 }
 0x2d3   : > { %v462_v33 = vpop.permute.xlu2 %461 }
 0x2d4   : > { %v463_v40 = vsel %vm1369_vm3, %v1183_v53, %v462_v33 }
 0x2d5   : > { %v464_v44 = vadd.f32 %v463_v40, %v460_v42 }
 0x2d7   : > { %v468_v46 = vadd.f32 %v467_v45, %v464_v44 }
 0x2db   : > { %v470_v43 = vpop.permute.xlu2 %469 }
 0x2dc   : > { %v471_v22 = vsel %vm1371_vm5, %v1183_v53, %v470_v43 }
 0x2dd   : > { %v472_v47 = vadd.f32 %v471_v22, %v468_v46 }
 0x2df   : > { %v476_v51 = vadd.f32 %v475_v49, %v472_v47 }
 0x2e3   : > { %v478_v24 = vpop.permute.xlu2 %477 }
 0x2e4   : > { %v479_v50 = vsel %vm1373_vm7, %v1183_v53, %v478_v24 }
 0x2e5   : > { %v480_v18 = vadd.f32 %v479_v50, %v476_v51 }
 0x2e7   : > { %v484_v57 = vadd.f32 %v483_v55, %v480_v18 }
 0x2eb   : > { %v486_v54 = vpop.permute.xlu2 %485 }
 0x2ec   : > { %v487_v56 = vsel %vm183_vm13, %v1183_v53, %v486_v54 }
 0x2ed   : > { %v488_v59 = vadd.f32 %v487_v56, %v484_v57 }
 0x2ef   : > { %v492_v61 = vadd.f32 %v491_v60, %v488_v59 }
 0x2f3   : > { %v494_v62 = vpop.permute.xlu2 %493 }
 0x2f4   : > { %v495_v63 = vsel %vm185_vm12, %v1183_v53, %v494_v62 }
 0x2f5   : > { %v496_v0 = vadd.f32 %v495_v63, %v492_v61 }
 0x2f7   : > { %v497_v1 = vmul.f32 0.04, %v496_v0 }
 0x2f9   : > { %661 = vst [vmem:[%s1128_s16 + $0x8] sm:$0xff] %v497_v1  ;;  %v500_v17 = vsub.f32 %v1142_v52, %v497_v1 }
 0x2fa   : > { %777 = shalt.err (!%p774_p3)
}
 0x2fb   : > { %s872_s17 = smov 128   ;;  %662 = vst [vmem:[%s1133_s14 + $0x8] sm:$0xff] %v500_v17  ;;  %s504_s21 = scalar_lea.sflag [#allocation3], %s1117_s23 }
 0x2fc   : > { %675 = dma.vmem_to_hbm [thread:$0]  (%p926_p5), %s539_s26, 256, %s541_s13, %s509_s30, %s872_s17, %s872_s17, %s1360_s29  }
 0x2fd   : > { %s792_s22 = sshra.s32 %s1285_s28, 4  ;;  %s798_s4 = scalar_lea.hbm %s1333_s1, 32  ;;  %s793_s22 = int_to_ptr.hbm [resolvable:$true] %s792_s22 }
 0x2fe   : > { %s794_s24 = scalar_lea.hbm %s793_s22, 16  ;;  %p799_p9 = scmp.lt.s32.totalorder %s793_s22, %s1333_s1 }
 0x2ff   : > { %p795_p4 = scmp.ne.s32.totalorder %s793_s22, %s794_s24  ;;  %p800_p10 = scmp.lt.s32.totalorder %s798_s4, %s794_s24 }
 0x301   : > { %p796_p7 = pnand %p795_p4, %p926_p5  ;;  %p801_p11 = por %p800_p10, %p799_p9 }
 0x303   : > { %p797_p8 = pneg %p796_p7 }
 0x305   : > { %p802_p12 = pnand %p801_p11, %p797_p8 }
 0x307   : > { %805 = shalt.err (!%p802_p12)
}
 0x308   : > { %674 = dma.vmem_to_hbm [thread:$0]  (%p926_p5), %s1283_s27, 256, %s1285_s28, %s504_s21, %s872_s17, %s872_s17, %s1360_s29  }
 0x309 PF: > { %p685_p13 = scmp.ge.s32.totalorder %s844_s12, 2  ;;  %s555_s14 = sand.u32 1, %s832_s9  }
 0x30a   : > { %s556_s23 = scalar_lea.sflag [#allocation3], %s555_s14 }
 0x30b   : > { %p679_p0 = pnand %p685_p13, %p930_p6 }
 0x30d   : > { %p680_p1 = pneg %p679_p0 }
 0x30f   : > { %823 = dma.done.wait (%p680_p1), %s556_s23, 256  }
 0x310   : > { %825 = vsyncadd (%p680_p1), %s556_s23, 4294967040  ;;  %s566_s26 = scalar_lea.sflag [#allocation5], %s555_s14 }
 0x311   : > { %827 = dma.done.wait (%p680_p1), %s566_s26, 256  }
 0x312   : > { %829 = vsyncadd (%p680_p1), %s566_s26, 4294967040  ;;  %p16_p5 = scmp.ge.s32.totalorder %s913_s15, 4   ;;  %s1374_s9 = smov %s836_s10 }
 0x313   : > { %s1375_s10 = smov %s840_s11  ;;  %s1376_s11 = smov %s924_s18 }
 0x314   : > { %s1377_s12 = smov %s913_s15  ;;  %18 = sbr.rel (!%p16_p5) target bundleno = 5 (0x5), region = 79 }
 0x319   :  { %572 = vsyncpa [#allocation3], 1 }
 0x31a   :  { %574 = vsyncpa [#allocation3 + $0x1], 1 }
 0x31b   :  { %575 = vsyncpa [#allocation5], 1 }
 0x31c   :  { %577 = vsyncpa [#allocation5 + $0x1], 1 }

</bundles_post_ra>
